<compile_context>
chip_gen: v7x
topology: tpu7x:2x2x1
jax: 0.10.0
libtpu: 0.0.40
codegen_flags: <defaults>
</compile_context>

<pallas_src>
import math

import jax
import jax.numpy as jnp
from jax.experimental import pallas as pl
from jax.experimental.pallas import tpu as pltpu

# ---- module hyper-parameters (small, consistent with the nn.Module ctor) ----
HEAD_NUM = 2
HEAD_SIZE = 16
ALL_HEAD = HEAD_NUM * HEAD_SIZE          # 32
LABEL_EBD = 24                           # params.label_ebd
HIDDEN_LAYER_SIZE = 40                   # HIDDEN_LAYER_SIZE
SQ = 8                                   # query sequence length (ebd)
SK = 8                                   # key/value sequence length (features)
BATCH = 2


def prepare_params(params, head_num=HEAD_NUM, head_size=HEAD_SIZE):
    """One-time parameter prep (call at setup time, NOT per forward call).

    - folds 1/sqrt(head_size) into Wq/bq
    - builds the fused [K | V_head0(lane-padded) | ... ] weight/bias so each
      head's value projection lands directly in its output lane range.
    """
    wq, bq, wk, bk, wv, bv = params
    all_head = wq.shape[1]
    scale = 1.0 / math.sqrt(head_size)

    wq_s = wq * scale
    bq_s = bq * scale

    col = jnp.arange(all_head)
    v_w = [wv * (col // head_size == h).astype(wv.dtype) for h in range(head_num)]
    v_b = [bv * (col // head_size == h).astype(bv.dtype) for h in range(head_num)]
    wkvv = jnp.concatenate([wk] + v_w, axis=1)        # (HIDDEN, (1+H)*ALL_HEAD)
    bkvv = jnp.concatenate([bk] + v_b, axis=1)        # (1, (1+H)*ALL_HEAD)
    return (wq_s, bq_s, wkvv, bkvv)


def _make_kernel(batch, sq, sk, head_num, head_size):
    all_head = head_num * head_size

    def kernel(ebd_ref, feat_ref, mask_ref, wq_ref, bq_ref, wkvv_ref, bkvv_ref,
               out_ref):
        """Single invocation over the whole (tiny) problem.

        ebd_ref  : (B*SQ, LABEL_EBD)
        feat_ref : (B*SK, HIDDEN_LAYER_SIZE)
        mask_ref : (B, SK)                        -- 1.0 = attend, 0.0 = masked
        wq_ref   : (LABEL_EBD, ALL_HEAD)  (scale pre-folded)   bq_ref: (1, ALL_HEAD)
        wkvv_ref : (HIDDEN, (1+H)*ALL_HEAD)       bkvv_ref: (1, (1+H)*ALL_HEAD)
                   columns = [ K | V_head0 (lane-padded) | V_head1 (lane-padded) ]
        out_ref  : (B*SQ, ALL_HEAD)
        """
        # Q projection over all batches at once (scale already folded in Wq/bq).
        q = jnp.dot(ebd_ref[...], wq_ref[...],
                    preferred_element_type=jnp.float32) + bq_ref[...]
        # Fused K / per-head-padded-V projection: one MXU push for K and both Vs.
        kvv = jnp.dot(feat_ref[...], wkvv_ref[...],
                      preferred_element_type=jnp.float32) + bkvv_ref[...]

        # Additive mask, computed once for all batches:
        # extended_attention_mask = (1 - mask) * -10000
        neg = (1.0 - mask_ref[...]) * (-10000.0)            # (B, SK)

        # ---- scores for every (batch, head), stacked along sublanes --------
        score_tiles = []
        for b in range(batch):                              # static, unrolled
            q_b = q[b * sq:(b + 1) * sq, :]                 # (SQ, ALL_HEAD)
            k_b = kvv[b * sk:(b + 1) * sk, :all_head]       # (SK, ALL_HEAD)
            neg_b = neg[b:b + 1, :]                         # (1, SK)
            for h in range(head_num):                       # static
                q_bh = q_b[:, h * head_size:(h + 1) * head_size]   # (SQ, HS)
                k_bh = k_b[:, h * head_size:(h + 1) * head_size]   # (SK, HS)
                # contract last dims directly (no materialized transpose)
                s = jax.lax.dot_general(
                    q_bh, k_bh, (((1,), (1,)), ((), ())),
                    preferred_element_type=jnp.float32)            # (SQ, SK)
                score_tiles.append(s + neg_b)

        scores = jnp.concatenate(score_tiles, axis=0)       # (B*H*SQ, SK)

        # ---- single merged softmax pass over all (batch, head) rows --------
        m = jnp.max(scores, axis=-1, keepdims=True)
        e = jnp.exp(scores - m)
        probs = e / jnp.sum(e, axis=-1, keepdims=True)      # exact divide
        # TODO(synk): nn.Dropout(0.3) is identity in eval mode; training dropout
        # would use pltpu.prng_seed / pltpu.stateful_bernoulli here.

        # ---- per-batch context; heads merge by add (V is lane-padded) ------
        for b in range(batch):                              # static, unrolled
            ctx_b = jnp.zeros((sq, all_head), jnp.float32)
            for h in range(head_num):                       # static
                r = (b * head_num + h) * sq
                p_bh = probs[r:r + sq, :]                   # (SQ, SK)
                # V for head h already sits in its output lane range
                # (other lanes zero), so merging heads is a plain add.
                v_bh = kvv[b * sk:(b + 1) * sk,
                           (1 + h) * all_head:(2 + h) * all_head]   # (SK, ALL_HEAD)
                ctx_b = ctx_b + jnp.dot(p_bh, v_bh,
                                        preferred_element_type=jnp.float32)
            # static sublane-slice store: zero-cost view into out_ref
            out_ref[b * sq:(b + 1) * sq, :] = ctx_b

    return kernel


def multi_atten(features, ebd, attention_mask, prepared, *, head_num=HEAD_NUM):
    """features: (B, SK, HIDDEN), ebd: (B, SQ, LABEL_EBD), attention_mask: (B, SK).

    `prepared` = prepare_params(raw_params): precomputed once at setup time.
    """
    wq_s, bq_s, wkvv, bkvv = prepared
    B, sk, hidden = features.shape
    _, sq, label = ebd.shape
    all_head = wq_s.shape[1]
    head_size = all_head // head_num

    # Flatten batch into rows for the projection matmuls (metadata-only reshape).
    ebd2 = ebd.reshape(B * sq, label)
    feat2 = features.reshape(B * sk, hidden)

    kernel = _make_kernel(B, sq, sk, head_num, head_size)
    vmem = pltpu.MemorySpace.VMEM
    out = pl.pallas_call(
        kernel,
        out_shape=jax.ShapeDtypeStruct((B * sq, all_head), jnp.float32),
        in_specs=[pl.BlockSpec(memory_space=vmem)] * 7,
        out_specs=pl.BlockSpec(memory_space=vmem),
    )(ebd2, feat2, attention_mask, wq_s, bq_s, wkvv, bkvv)

    # atten_features = context.view(batch_size, -1)  (metadata-only reshape)
    return out.reshape(B, sq * all_head)


def _reference(features, ebd, attention_mask, params):
    """Pure-JAX reference mirroring the PyTorch forward (eval-mode dropout)."""
    wq, bq, wk, bk, wv, bv = params
    B = features.shape[0]
    q = ebd @ wq + bq
    k = features @ wk + bk
    v = features @ wv + bv

    def split(x):
        return x.reshape(B, -1, HEAD_NUM, HEAD_SIZE).transpose(0, 2, 1, 3)

    qh, kh, vh = split(q), split(k), split(v)
    ext = (1.0 - attention_mask)[:, None, None, :] * (-10000.0)
    scores = jnp.einsum("bhqd,bhkd->bhqk", qh, kh) / math.sqrt(HEAD_SIZE) + ext
    probs = jax.nn.softmax(scores, axis=-1)
    ctx = jnp.einsum("bhqk,bhkd->bhqd", probs, vh)
    ctx = ctx.transpose(0, 2, 1, 3).reshape(B, -1, ALL_HEAD)
    return ctx.reshape(B, -1)


if __name__ == "__main__":
    key = jax.random.PRNGKey(0)
    ks = jax.random.split(key, 9)

    features = jax.random.normal(ks[0], (BATCH, SK, HIDDEN_LAYER_SIZE), jnp.float32)
    ebd = jax.random.normal(ks[1], (BATCH, SQ, LABEL_EBD), jnp.float32)
    # mask: 1.0 for valid key positions, last two positions of batch 1 masked out
    attention_mask = jnp.ones((BATCH, SK), jnp.float32).at[1, -2:].set(0.0)

    # deterministic "nn.Linear" parameters (stored already transposed: (in, out))
    wq = jax.random.normal(ks[2], (LABEL_EBD, ALL_HEAD), jnp.float32) * 0.1
    bq = jax.random.normal(ks[3], (1, ALL_HEAD), jnp.float32) * 0.1
    wk = jax.random.normal(ks[4], (HIDDEN_LAYER_SIZE, ALL_HEAD), jnp.float32) * 0.1
    bk = jax.random.normal(ks[5], (1, ALL_HEAD), jnp.float32) * 0.1
    wv = jax.random.normal(ks[6], (HIDDEN_LAYER_SIZE, ALL_HEAD), jnp.float32) * 0.1
    bv = jax.random.normal(ks[7], (1, ALL_HEAD), jnp.float32) * 0.1
    params = (wq, bq, wk, bk, wv, bv)

    # One-time parameter fusion (scale fold + lane-padded V pack) at setup time.
    prepared = jax.block_until_ready(prepare_params(params))

    out = multi_atten(features, ebd, attention_mask, prepared)
    out = jax.block_until_ready(out)

    ref = _reference(features, ebd, attention_mask, params)
    assert out.shape == (BATCH, SQ * ALL_HEAD), out.shape
    assert jnp.allclose(out, ref, atol=1e-3, rtol=1e-3), float(jnp.max(jnp.abs(out - ref)))

    print("KERNEL_OK")
</pallas_src>

<mosaic_0001>
module attributes {stable_mosaic.version = 11 : i64} {
  func.func @kernel(%arg0: memref<16x24xf32, #tpu.memory_space<vmem>>, %arg1: memref<16x40xf32, #tpu.memory_space<vmem>>, %arg2: memref<2x8xf32, #tpu.memory_space<vmem>>, %arg3: memref<24x32xf32, #tpu.memory_space<vmem>>, %arg4: memref<1x32xf32, #tpu.memory_space<vmem>>, %arg5: memref<40x96xf32, #tpu.memory_space<vmem>>, %arg6: memref<1x96xf32, #tpu.memory_space<vmem>>, %arg7: memref<16x32xf32, #tpu.memory_space<vmem>>) attributes {dimension_semantics = [], scalar_prefetch = 0 : i64, scratch_operands = 0 : i64, tpu.core_type = #tpu.core_type<tc>} {
    %c0 = arith.constant 0 : index
    %c0_0 = arith.constant 0 : index
    %0 = vector.load %arg0[%c0, %c0_0] : memref<16x24xf32, #tpu.memory_space<vmem>>, vector<16x24xf32>
    %c0_1 = arith.constant 0 : index
    %c0_2 = arith.constant 0 : index
    %1 = vector.load %arg3[%c0_1, %c0_2] : memref<24x32xf32, #tpu.memory_space<vmem>>, vector<24x32xf32>
    %cst = arith.constant dense<0.000000e+00> : vector<16x32xf32>
    %2 = tpu.matmul %0, %1, %cst {dimension_numbers = #tpu.dot_dimension_numbers<[1], [0], [0], [1], [0, 0, 1, 1], [], []>} : vector<16x24xf32>, vector<24x32xf32>, vector<16x32xf32> -> vector<16x32xf32>
    %c0_3 = arith.constant 0 : index
    %c0_4 = arith.constant 0 : index
    %3 = vector.load %arg4[%c0_3, %c0_4] : memref<1x32xf32, #tpu.memory_space<vmem>>, vector<1x32xf32>
    %4 = vector.broadcast %3 : vector<1x32xf32> to vector<16x32xf32>
    %5 = arith.addf %2, %4 : vector<16x32xf32>
    %c0_5 = arith.constant 0 : index
    %c0_6 = arith.constant 0 : index
    %6 = vector.load %arg1[%c0_5, %c0_6] : memref<16x40xf32, #tpu.memory_space<vmem>>, vector<16x40xf32>
    %c0_7 = arith.constant 0 : index
    %c0_8 = arith.constant 0 : index
    %7 = vector.load %arg5[%c0_7, %c0_8] : memref<40x96xf32, #tpu.memory_space<vmem>>, vector<40x96xf32>
    %cst_9 = arith.constant dense<0.000000e+00> : vector<16x96xf32>
    %8 = tpu.matmul %6, %7, %cst_9 {dimension_numbers = #tpu.dot_dimension_numbers<[1], [0], [0], [1], [0, 0, 1, 1], [], []>} : vector<16x40xf32>, vector<40x96xf32>, vector<16x96xf32> -> vector<16x96xf32>
    %c0_10 = arith.constant 0 : index
    %c0_11 = arith.constant 0 : index
    %9 = vector.load %arg6[%c0_10, %c0_11] : memref<1x96xf32, #tpu.memory_space<vmem>>, vector<1x96xf32>
    %10 = vector.broadcast %9 : vector<1x96xf32> to vector<16x96xf32>
    %11 = arith.addf %8, %10 : vector<16x96xf32>
    %c0_12 = arith.constant 0 : index
    %c0_13 = arith.constant 0 : index
    %12 = vector.load %arg2[%c0_12, %c0_13] : memref<2x8xf32, #tpu.memory_space<vmem>>, vector<2x8xf32>
    %cst_14 = arith.constant 1.000000e+00 : f32
    %13 = vector.broadcast %cst_14 : f32 to vector<2x8xf32>
    %14 = arith.subf %13, %12 : vector<2x8xf32>
    %cst_15 = arith.constant -1.000000e+04 : f32
    %15 = vector.broadcast %cst_15 : f32 to vector<2x8xf32>
    %16 = arith.mulf %14, %15 : vector<2x8xf32>
    %17 = vector.extract_strided_slice %5 {offsets = [0, 0], sizes = [8, 32], strides = [1, 1]} : vector<16x32xf32> to vector<8x32xf32>
    %18 = vector.extract_strided_slice %11 {offsets = [0, 0], sizes = [8, 32], strides = [1, 1]} : vector<16x96xf32> to vector<8x32xf32>
    %19 = vector.extract_strided_slice %16 {offsets = [0, 0], sizes = [1, 8], strides = [1, 1]} : vector<2x8xf32> to vector<1x8xf32>
    %20 = vector.extract_strided_slice %17 {offsets = [0, 0], sizes = [8, 16], strides = [1, 1]} : vector<8x32xf32> to vector<8x16xf32>
    %21 = vector.extract_strided_slice %18 {offsets = [0, 0], sizes = [8, 16], strides = [1, 1]} : vector<8x32xf32> to vector<8x16xf32>
    %cst_16 = arith.constant dense<0.000000e+00> : vector<8x8xf32>
    %22 = tpu.matmul %20, %21, %cst_16 {dimension_numbers = #tpu.dot_dimension_numbers<[1], [1], [0], [0], [0, 0, 1, 0], [], []>} : vector<8x16xf32>, vector<8x16xf32>, vector<8x8xf32> -> vector<8x8xf32>
    %23 = vector.broadcast %19 : vector<1x8xf32> to vector<8x8xf32>
    %24 = arith.addf %22, %23 : vector<8x8xf32>
    %25 = vector.extract_strided_slice %17 {offsets = [0, 16], sizes = [8, 16], strides = [1, 1]} : vector<8x32xf32> to vector<8x16xf32>
    %26 = vector.extract_strided_slice %18 {offsets = [0, 16], sizes = [8, 16], strides = [1, 1]} : vector<8x32xf32> to vector<8x16xf32>
    %cst_17 = arith.constant dense<0.000000e+00> : vector<8x8xf32>
    %27 = tpu.matmul %25, %26, %cst_17 {dimension_numbers = #tpu.dot_dimension_numbers<[1], [1], [0], [0], [0, 0, 1, 0], [], []>} : vector<8x16xf32>, vector<8x16xf32>, vector<8x8xf32> -> vector<8x8xf32>
    %28 = vector.broadcast %19 : vector<1x8xf32> to vector<8x8xf32>
    %29 = arith.addf %27, %28 : vector<8x8xf32>
    %30 = vector.extract_strided_slice %5 {offsets = [8, 0], sizes = [8, 32], strides = [1, 1]} : vector<16x32xf32> to vector<8x32xf32>
    %31 = vector.extract_strided_slice %11 {offsets = [8, 0], sizes = [8, 32], strides = [1, 1]} : vector<16x96xf32> to vector<8x32xf32>
    %32 = vector.extract_strided_slice %16 {offsets = [1, 0], sizes = [1, 8], strides = [1, 1]} : vector<2x8xf32> to vector<1x8xf32>
    %33 = vector.extract_strided_slice %30 {offsets = [0, 0], sizes = [8, 16], strides = [1, 1]} : vector<8x32xf32> to vector<8x16xf32>
    %34 = vector.extract_strided_slice %31 {offsets = [0, 0], sizes = [8, 16], strides = [1, 1]} : vector<8x32xf32> to vector<8x16xf32>
    %cst_18 = arith.constant dense<0.000000e+00> : vector<8x8xf32>
    %35 = tpu.matmul %33, %34, %cst_18 {dimension_numbers = #tpu.dot_dimension_numbers<[1], [1], [0], [0], [0, 0, 1, 0], [], []>} : vector<8x16xf32>, vector<8x16xf32>, vector<8x8xf32> -> vector<8x8xf32>
    %36 = vector.broadcast %32 : vector<1x8xf32> to vector<8x8xf32>
    %37 = arith.addf %35, %36 : vector<8x8xf32>
    %38 = vector.extract_strided_slice %30 {offsets = [0, 16], sizes = [8, 16], strides = [1, 1]} : vector<8x32xf32> to vector<8x16xf32>
    %39 = vector.extract_strided_slice %31 {offsets = [0, 16], sizes = [8, 16], strides = [1, 1]} : vector<8x32xf32> to vector<8x16xf32>
    %cst_19 = arith.constant dense<0.000000e+00> : vector<8x8xf32>
    %40 = tpu.matmul %38, %39, %cst_19 {dimension_numbers = #tpu.dot_dimension_numbers<[1], [1], [0], [0], [0, 0, 1, 0], [], []>} : vector<8x16xf32>, vector<8x16xf32>, vector<8x8xf32> -> vector<8x8xf32>
    %41 = vector.broadcast %32 : vector<1x8xf32> to vector<8x8xf32>
    %42 = arith.addf %40, %41 : vector<8x8xf32>
    %43 = tpu.concatenate %24, %29, %37, %42 in 0 : vector<8x8xf32>, vector<8x8xf32>, vector<8x8xf32>, vector<8x8xf32> -> vector<32x8xf32>
    %cst_20 = arith.constant dense<0xFF800000> : vector<32xf32>
    %44 = vector.multi_reduction <maximumf>, %43, %cst_20 [1] : vector<32x8xf32> to vector<32xf32>
    %45 = vector.shape_cast %44 : vector<32xf32> to vector<32x1xf32>
    %46 = vector.broadcast %45 : vector<32x1xf32> to vector<32x8xf32>
    %47 = arith.subf %43, %46 : vector<32x8xf32>
    %48 = math.exp %47 : vector<32x8xf32>
    %cst_21 = arith.constant dense<0.000000e+00> : vector<32xf32>
    %49 = vector.multi_reduction <add>, %48, %cst_21 [1] : vector<32x8xf32> to vector<32xf32>
    %50 = vector.shape_cast %49 : vector<32xf32> to vector<32x1xf32>
    %51 = vector.broadcast %50 : vector<32x1xf32> to vector<32x8xf32>
    %52 = arith.divf %48, %51 : vector<32x8xf32>
    %cst_22 = arith.constant 0.000000e+00 : f32
    %53 = vector.broadcast %cst_22 : f32 to vector<8x32xf32>
    %54 = vector.extract_strided_slice %52 {offsets = [0, 0], sizes = [8, 8], strides = [1, 1]} : vector<32x8xf32> to vector<8x8xf32>
    %55 = vector.extract_strided_slice %11 {offsets = [0, 32], sizes = [8, 32], strides = [1, 1]} : vector<16x96xf32> to vector<8x32xf32>
    %cst_23 = arith.constant dense<0.000000e+00> : vector<8x32xf32>
    %56 = tpu.matmul %54, %55, %cst_23 {dimension_numbers = #tpu.dot_dimension_numbers<[1], [0], [0], [1], [0, 0, 1, 1], [], []>} : vector<8x8xf32>, vector<8x32xf32>, vector<8x32xf32> -> vector<8x32xf32>
    %57 = arith.addf %53, %56 : vector<8x32xf32>
    %58 = vector.extract_strided_slice %52 {offsets = [8, 0], sizes = [8, 8], strides = [1, 1]} : vector<32x8xf32> to vector<8x8xf32>
    %59 = vector.extract_strided_slice %11 {offsets = [0, 64], sizes = [8, 32], strides = [1, 1]} : vector<16x96xf32> to vector<8x32xf32>
    %cst_24 = arith.constant dense<0.000000e+00> : vector<8x32xf32>
    %60 = tpu.matmul %58, %59, %cst_24 {dimension_numbers = #tpu.dot_dimension_numbers<[1], [0], [0], [1], [0, 0, 1, 1], [], []>} : vector<8x8xf32>, vector<8x32xf32>, vector<8x32xf32> -> vector<8x32xf32>
    %61 = arith.addf %57, %60 : vector<8x32xf32>
    %c0_25 = arith.constant 0 : index
    %c0_26 = arith.constant 0 : index
    %62 = vector.load %arg7[%c0_25, %c0_26] : memref<16x32xf32, #tpu.memory_space<vmem>>, vector<8x32xf32>
    tpu.vector_store %arg7[%c0_25, %c0_26], %61 {strides = array<i32>} : memref<16x32xf32, #tpu.memory_space<vmem>>, vector<8x32xf32>,
    %cst_27 = arith.constant 0.000000e+00 : f32
    %63 = vector.broadcast %cst_27 : f32 to vector<8x32xf32>
    %64 = vector.extract_strided_slice %52 {offsets = [16, 0], sizes = [8, 8], strides = [1, 1]} : vector<32x8xf32> to vector<8x8xf32>
    %65 = vector.extract_strided_slice %11 {offsets = [8, 32], sizes = [8, 32], strides = [1, 1]} : vector<16x96xf32> to vector<8x32xf32>
    %cst_28 = arith.constant dense<0.000000e+00> : vector<8x32xf32>
    %66 = tpu.matmul %64, %65, %cst_28 {dimension_numbers = #tpu.dot_dimension_numbers<[1], [0], [0], [1], [0, 0, 1, 1], [], []>} : vector<8x8xf32>, vector<8x32xf32>, vector<8x32xf32> -> vector<8x32xf32>
    %67 = arith.addf %63, %66 : vector<8x32xf32>
    %68 = vector.extract_strided_slice %52 {offsets = [24, 0], sizes = [8, 8], strides = [1, 1]} : vector<32x8xf32> to vector<8x8xf32>
    %69 = vector.extract_strided_slice %11 {offsets = [8, 64], sizes = [8, 32], strides = [1, 1]} : vector<16x96xf32> to vector<8x32xf32>
    %cst_29 = arith.constant dense<0.000000e+00> : vector<8x32xf32>
    %70 = tpu.matmul %68, %69, %cst_29 {dimension_numbers = #tpu.dot_dimension_numbers<[1], [0], [0], [1], [0, 0, 1, 1], [], []>} : vector<8x8xf32>, vector<8x32xf32>, vector<8x32xf32> -> vector<8x32xf32>
    %71 = arith.addf %67, %70 : vector<8x32xf32>
    %c8 = arith.constant 8 : index
    %c0_30 = arith.constant 0 : index
    %72 = vector.load %arg7[%c8, %c0_30] : memref<16x32xf32, #tpu.memory_space<vmem>>, vector<8x32xf32>
    tpu.vector_store %arg7[%c8, %c0_30], %71 {strides = array<i32>} : memref<16x32xf32, #tpu.memory_space<vmem>>, vector<8x32xf32>,
    return
  }
}

</mosaic_0001>

<bundles_post_ra>
// kernel: tpu_custom_call.1
= control target key start
LH: loop header
LB: loop body
LE: loop exit
PB: predicated region body
PF: predicated region fallthrough
CT: control target
= control target key end

     0   :  { %12 = vsyncpa [#allocation3], 0  ;;  %s1443_s0 = inlined_call_operand.hbm [shape: f32[16,24], index: 0, kind: input, shape index: {}]   ;;  %s1444_s1 = inlined_call_operand.hbm [shape: f32[16,40], index: 1, kind: input, shape index: {}]   ;;  %s1445_s2 = inlined_call_operand.vmem [shape: f32[2,8], index: 2, kind: input, shape index: {}]   ;;  %s1446_s3 = inlined_call_operand.hbm [shape: f32[24,32], index: 3, kind: input, shape index: {}]   ;;  %s1447_s4 = inlined_call_operand.vmem [shape: f32[1,32], index: 4, kind: input, shape index: {}]   ;;  %s1448_s5 = inlined_call_operand.hbm [shape: f32[40,96], index: 5, kind: input, shape index: {}]   ;;  %s1449_s6 = inlined_call_operand.vmem [shape: f32[1,96], index: 6, kind: input, shape index: {}]   ;;  %s1450_s7 = inlined_call_operand.hbm [shape: f32[16,32], index: 7, kind: output, shape index: {}]  }
   0x1   :  { %13 = vsyncpa [#allocation6], 0 }
   0x2   :  { %14 = vsyncpa [#allocation9], 0 }
   0x3   :  { %15 = vsyncpa [#allocation4], 0  ;;  %s1233_s24 = smov [#allocation5]   ;;  %s1234_s26 = smov [#allocation2]  }
   0x4   :  { %s33_s25 = sshll.u32 %s1233_s24, 4  ;;  %s21_s27 = sshll.u32 %s1234_s26, 4  ;;  %s34_s25 = int_to_ptr.vmem [resolvable:$true] %s33_s25  ;;  %s1285_s27 = int_to_ptr.vmem [resolvable:$true] %s21_s27 }
   0x5   :  { %s1115_s30 = scalar_lea.hbm %s1444_s1, 256 }
   0x6   :  { %p1116_p0 = scmp.ne.s32.totalorder %s1444_s1, %s1115_s30  ;;  %p1119_p1 = scmp.lt.u32.totalorder %s1115_s30, %s1444_s1 }
   0x8   :  { %p1121_p2 = pnand %p1119_p1, %p1116_p0 }
   0xa   :  { %1124 = shalt.err (!%p1121_p2)
}
   0xb   :  { %s1125_s12 = scalar_lea.vmem %s34_s25, 256  ;;  %p1130_p4 = scmp.lt.s32.totalorder %s34_s25, %s34_s25 }
   0xc   :  { %p1126_p3 = scmp.ne.s32.totalorder %s34_s25, %s1125_s12  ;;  %p1131_p5 = scmp.lt.s32.totalorder %s1125_s12, %s1125_s12 }
   0xe   :  { %p1132_p6 = por %p1131_p5, %p1130_p4 }
  0x10   :  { %p1133_p7 = pnand %p1132_p6, %p1126_p3 }
  0x12   :  { %1136 = shalt.err (!%p1133_p7)
}
  0x13   :  { %s1235_s13 = smov 128   ;;  %s1236_s14 = smov 8  }
  0x14   :  { %39 = dma.hbm_to_vmem [thread:$0]  %s1444_s1, 256, %s34_s25, [#allocation6], %s1235_s13, %s1235_s13, %s1236_s14  }
  0x15   :  { %s1137_s19 = scalar_lea.hbm %s1443_s0, 256 }
  0x16   :  { %p1138_p8 = scmp.ne.s32.totalorder %s1443_s0, %s1137_s19  ;;  %p1141_p9 = scmp.lt.u32.totalorder %s1137_s19, %s1443_s0 }
  0x18   :  { %p1143_p10 = pnand %p1141_p9, %p1138_p8 }
  0x1a   :  { %1146 = shalt.err (!%p1143_p10)
}
  0x1b   :  { %s1147_s24 = scalar_lea.vmem %s1285_s27, 256  ;;  %p1152_p12 = scmp.lt.s32.totalorder %s1285_s27, %s1285_s27 }
  0x1c   :  { %p1148_p11 = scmp.ne.s32.totalorder %s1285_s27, %s1147_s24  ;;  %p1153_p13 = scmp.lt.s32.totalorder %s1147_s24, %s1147_s24 }
  0x1e   :  { %p1154_p0 = por %p1153_p13, %p1152_p12 }
  0x20   :  { %p1155_p1 = pnand %p1154_p0, %p1148_p11 }
  0x22   :  { %1158 = shalt.err (!%p1155_p1)
}
  0x23   :  { %27 = dma.hbm_to_vmem [thread:$0]  %s1443_s0, 256, %s1285_s27, [#allocation3], %s1235_s13, %s1235_s13, %s1236_s14  }
  0x24   :  { %s1237_s26 = smov [#allocation7]   ;;  %s1238_s29 = smov [#allocation8]  }
  0x25   :  { %s47_s28 = sshll.u32 %s1237_s26, 4  ;;  %s61_s30 = sshll.u32 %s1238_s29, 4  ;;  %s48_s28 = int_to_ptr.vmem [resolvable:$true] %s47_s28  ;;  %s1322_s30 = int_to_ptr.vmem [resolvable:$true] %s61_s30 }
  0x26   :  { %s1159_s10 = scalar_lea.hbm %s1446_s3, 384 }
  0x27   :  { %p1160_p2 = scmp.ne.s32.totalorder %s1446_s3, %s1159_s10  ;;  %p1163_p3 = scmp.lt.u32.totalorder %s1159_s10, %s1446_s3 }
  0x29   :  { %p1165_p4 = pnand %p1163_p3, %p1160_p2 }
  0x2b   :  { %1168 = shalt.err (!%p1165_p4)
}
  0x2c   :  { %s1169_s0 = scalar_lea.vmem %s48_s28, 384  ;;  %p1174_p6 = scmp.lt.s32.totalorder %s48_s28, %s48_s28 }
  0x2d   :  { %p1170_p5 = scmp.ne.s32.totalorder %s48_s28, %s1169_s0  ;;  %p1175_p7 = scmp.lt.s32.totalorder %s1169_s0, %s1169_s0 }
  0x2f   :  { %p1176_p8 = por %p1175_p7, %p1174_p6 }
  0x31   :  { %p1177_p9 = pnand %p1176_p8, %p1170_p5 }
  0x33   :  { %1180 = shalt.err (!%p1177_p9)
}
  0x34   :  { %53 = dma.hbm_to_vmem [thread:$0]  %s1446_s3, 384, %s48_s28, [#allocation6], %s1235_s13, %s1235_s13, %s1236_s14  }
  0x35   :  { %s1181_s20 = scalar_lea.hbm %s1448_s5, 640 }
  0x36   :  { %p1182_p10 = scmp.ne.s32.totalorder %s1448_s5, %s1181_s20  ;;  %p1185_p11 = scmp.lt.u32.totalorder %s1181_s20, %s1448_s5 }
  0x38   :  { %p1187_p12 = pnand %p1185_p11, %p1182_p10 }
  0x3a   :  { %1190 = shalt.err (!%p1187_p12)
}
  0x3b   :  { %s1191_s1 = scalar_lea.vmem %s1322_s30, 640  ;;  %p1196_p0 = scmp.lt.s32.totalorder %s1322_s30, %s1322_s30 }
  0x3c   :  { %p1192_p13 = scmp.ne.s32.totalorder %s1322_s30, %s1191_s1  ;;  %p1197_p1 = scmp.lt.s32.totalorder %s1191_s1, %s1191_s1 }
  0x3e   :  { %p1198_p2 = por %p1197_p1, %p1196_p0 }
  0x40   :  { %p1199_p3 = pnand %p1198_p2, %p1192_p13 }
  0x42   :  { %1202 = shalt.err (!%p1199_p3)
}
  0x43   :  { %67 = dma.hbm_to_vmem [thread:$0]  %s1448_s5, 640, %s1322_s30, [#allocation9], %s1235_s13, %s1235_s13, %s1236_s14  }
  0x44   :  { %1225 = dma.done.wait [#allocation3], 256  }
  0x45   :  { %1226 = vsyncadd [#allocation3], 4294967040 }
  0x46   :  { %1227 = dma.done.wait [#allocation6], 640  }
  0x47   :  { %1228 = vsyncadd [#allocation6], 4294966656 }
  0x48   :  { %1229 = dma.done.wait [#allocation9], 640  }
  0x49   :  { %1230 = vsyncadd [#allocation9], 4294966656  ;;  %v178_v0 = vld [vmem:[#allocation8] sm:$0xff]  ;;  %v179_v1 = vld [vmem:[#allocation8 + $0x8] sm:$0xff]  ;;  %vm190_vm0 = vcmask 326656   ;;  %vm94_vm1 = vcmask 195584   ;;  %v275_v34 = vlaneseq }
  0x4a   :  { %v180_v2 = vld [vmem:[#allocation8 + $0x10] sm:$0xff]  ;;  %v1075_v3 = vpack.c.bf16 %v179_v1, %v178_v0  ;;  %v181_v4 = vld [vmem:[#allocation8 + $0x18] sm:$0xff]  ;;  %v84_v5 = vld [vmem:[#allocation7] sm:$0xff]  ;;  %v1239_v15 = vmov 0.0   ;;  %vm1240_vm2 = vmmov 0   ;;  %vm279_vm3 = vcmask 130048  }
  0x4b   :  { %v85_v6 = vld [vmem:[#allocation7 + $0x8] sm:$0xff]  ;;  %v1079_v7 = vpack.c.bf16 %v181_v4, %v180_v2  ;;  %v176_v9 = vld [vmem:[#allocation5] sm:$0xff]  ;;  %v82_v11 = vld [vmem:[#allocation2] sm:$0xff]  ;;  %s1241_s30 = smov 112   ;;  %v276_v37 = vshrl.u32 %v275_v34, 7  ;;  %vm592_vm4 = vcmask 64512  }
  0x4c   :  { %v1071_v8 = vpack.c.bf16 %v85_v6, %v84_v5  ;;  %1076 = vmatprep.subr.bf16.mxu1 %v1075_v3  ;;  %1028 = vmatprep.mubr.msk.f32.mxu1 %vm190_vm0, %v176_v9  ;;  %v86_v10 = vld [vmem:[#allocation7 + $0x10] sm:$0xff]  ;;  %v182_v12 = vld [vmem:[#allocation8 + $0x20] sm:$0xff]  ;;  %v83_v13 = vld [vmem:[#allocation2 + $0x8] sm:$0xff]  ;;  %s1243_s8 = smov 96   ;;  %vm789_vm5 = vcmask 261120   ;;  %s1244_s9 = smov [#allocation10]  }
  0x4d   :  { %1078 = vmatpush3.bf16.msra.mxu1 %v1075_v3  ;;  %1015 = vmatprep.mubr.msk.f32.mxu0 %vm94_vm1, %v82_v11  ;;  %v177_v14 = vld [vmem:[#allocation5 + $0x8] sm:$0xff]  ;;  %v966_v17 = vld [vmem:[%s1449_s6] ss:$0 sm:$0xff]  ;;  %v277_v39 = vsub.s32 0, %v276_v37  ;;  %v436_v40 = vsub.s32 1, %v276_v37  ;;  %s949_s10 = sshll.u32 %s1244_s9, 4  ;;  %s950_s10 = int_to_ptr.vmem [resolvable:$true] %s949_s10 }
  0x4e   :  { %1072 = vmatprep.subr.bf16.mxu0 %v1071_v8  ;;  %1080 = vmatprep.subr.bf16.mxu1 %v1079_v7  ;;  %v963_v19 = vld [vmem:[%s1447_s4] ss:$0 sm:$0xff]  ;;  %s1203_s11 = scalar_lea.vmem %s950_s10, 256  ;;  %p1208_p5 = scmp.lt.s32.totalorder %s950_s10, %s950_s10 }
  0x4f   :  { %1074 = vmatpush3.bf16.msra.mxu0 %v1071_v8  ;;  %v272_v35 = vld [vmem:[%s1445_s2] sm:$0x3]  ;;  %s1242_s2 = smov 64   ;;  %p1204_p4 = scmp.ne.s32.totalorder %s950_s10, %s1203_s11 }
  0x50   :  { %1013 = vmatprep.subr.mxu0 %v86_v10  ;;  %v273_v36 = vsub.f32 1.0, %v272_v35  ;;  %p1209_p6 = scmp.lt.s32.totalorder %s1203_s11, %s1203_s11 }
  0x51   :  { %1082 = vmatpush3.bf16.msra.mxu1 %v1079_v7 }
  0x52   :  { %1026 = vmatprep.subr.mxu1 %v182_v12  ;;  %v274_v38 = vmul.f32 -10000.0, %v273_v36  ;;  %p1210_p7 = por %p1209_p6, %p1208_p5 }
  0x53   :  { %1014 = vmatpush3.msra.mxu0 %v86_v10 }
  0x54   :  { %1016 = vmatmul.mubr.msk.f32.vlgmr.msra.gmra.mrb[0].mxu0 %vm94_vm1, %v83_v13  ;;  %1031 = vmatprep.subr.mxu0 %v1239_v15  ;;  %v278_v41 = vrot.slane %v274_v38, %v277_v39  ;;  %v437_v45 = vrot.slane %v274_v38, %v436_v40  ;;  %p1211_p8 = pnand %p1210_p7, %p1204_p4 }
  0x55   :  { %1027 = vmatpush3.msra.mxu1 %v182_v12  ;;  %1033 = vmatprep.mubr.msk.f32.mxu0 %vm1240_vm2, %v1239_v15 }
  0x56   :  { %1029 = vmatmul.mubr.msk.f32.vlgmr.msra.gmra.mrb[0].mxu1 %vm190_vm0, %v177_v14  ;;  %1041 = vmatprep.subr.mxu1 %v1239_v15 }
  0x57   :  { %1043 = vmatprep.mubr.msk.f32.mxu1 %vm1240_vm2, %v1239_v15 }
 0x127   :  { %v1017_v16 = vpop.f32.mrb[0].mxu0 }
 0x128   :  { %v167_v18 = vpop.f32.mrb[1].mxu0  ;;  %v173_v24 = vadd.f32 %v1017_v16, %v963_v19 }
 0x129   :  { %v1030_v20 = vpop.f32.mrb[0].mxu1  ;;  %v168_v25 = vadd.f32 %v963_v19, %v167_v18 }
 0x12a   :  { %v1373_v21 = vadd.f32 %v1030_v20, %v966_v17  ;;  %v263_v22 = vpop.f32.mrb[1].mxu1 }
 0x12b   :  { %v1375_v23 = vadd.f32 %v966_v17, %v263_v22 }
 0x12c   :  { %516 = vrot.lane.b32.xlu1 %v1373_v21, %s1241_s30  ;;  %1042 = vmatpush3.xpose.msk.msra.mxu1 %vm279_vm3, %v1373_v21 }
 0x12d   :  { %358 = vrot.lane.b32.xlu0 %v1375_v23, %s1241_s30  ;;  %1032 = vmatpush3.xpose.msk.msra.mxu0 %vm279_vm3, %v1375_v23 }
 0x12e   :  { %1036 = vmatprep.subr.mxu0 %v1239_v15  ;;  %1051 = vmatprep.subr.mxu1 %v1239_v15 }
 0x12f   :  { %1044 = vmatmul.mubr.msk.f32.vlgmr.msra.gmra.mrb[2].mxu1 %vm279_vm3, %v173_v24 }
 0x130   :  { %514 = vrot.lane.b32.xlu1 %v173_v24, %s1241_s30  ;;  %1034 = vmatmul.mubr.msk.f32.vlgmr.msra.gmra.mrb[2].mxu0 %vm279_vm3, %v168_v25 }
 0x131   :  { %356 = vrot.lane.b32.xlu0 %v168_v25, %s1241_s30  ;;  %1038 = vmatprep.mubr.msk.f32.mxu0 %vm1240_vm2, %v1239_v15 }
 0x132   :  { %1053 = vmatprep.mubr.msk.f32.mxu1 %vm1240_vm2, %v1239_v15 }
 0x19e   :  { %v517_v27 = vpop.permute.xlu1 %516 }
 0x19f   :  { %v359_v26 = vpop.permute.xlu0 %358 }
 0x1a0   :  { %1037 = vmatpush3.xpose.msk.msra.mxu0 %vm279_vm3, %v359_v26 }
 0x1a1   :  { %1046 = vmatprep.subr.mxu0 %v1239_v15 }
 0x1a2   :  { %v515_v29 = vpop.permute.xlu1 %514 }
 0x1a3   :  { %v357_v28 = vpop.permute.xlu0 %356 }
 0x1a4   :  { %1039 = vmatmul.mubr.msk.f32.vlgmr.msra.gmra.mrb[4].mxu0 %vm279_vm3, %v357_v28 }
 0x1a5   :  { %1047 = vmatpush3.xpose.msk.msra.mxu0 %vm279_vm3, %v517_v27  ;;  %1048 = vmatprep.mubr.msk.f32.mxu0 %vm1240_vm2, %v1239_v15 }
 0x1a6   :  { %1061 = vmatprep.subr.mxu0 %v1239_v15 }
 0x1a8   :  { %1049 = vmatmul.mubr.msk.f32.vlgmr.msra.gmra.mrb[6].mxu0 %vm279_vm3, %v515_v29 }
 0x1a9   :  { %1063 = vmatprep.mubr.msk.f32.mxu0 %vm1240_vm2, %v1239_v15 }
 0x202   :  { %v510_v30 = vpop.f32.mrb[2].mxu1 }
 0x203   :  { %v352_v31 = vpop.f32.mrb[2].mxu0  ;;  %v1045_v32 = vpop.f32.mrb[3].mxu1  ;;  %v511_v51 = vadd.f32 %v510_v30, %v437_v45 }
 0x204   :  { %v1035_v33 = vpop.f32.mrb[3].mxu0  ;;  %v353_v46 = vadd.f32 %v352_v31, %v278_v41 }
 0x205   :  { %v599_v54 = vsel %vm592_vm4, %v511_v51, -inf }
 0x206   :  { %v593_v52 = vsel %vm592_vm4, %v353_v46, -inf }
 0x277   :  { %v430_v42 = vpop.f32.mrb[4].mxu0 }
 0x278   :  { %v431_v43 = vadd.f32 %v430_v42, %v278_v41  ;;  %v1040_v44 = vpop.f32.mrb[5].mxu0 }
 0x27a   :  { %v596_v47 = vsel %vm592_vm4, %v431_v43, -inf }
 0x27b   :  { %597 = vmax.xlane.f32.xlu0 %v596_v47  ;;  %v588_v48 = vpop.f32.mrb[6].mxu0 }
 0x27c   :  { %v589_v49 = vadd.f32 %v588_v48, %v437_v45  ;;  %v1050_v50 = vpop.f32.mrb[7].mxu0 }
 0x27e   :  { %v602_v53 = vsel %vm592_vm4, %v589_v49, -inf }
 0x27f   :  { %594 = vmax.xlane.f32.xlu0 %v593_v52  ;;  %603 = vmax.xlane.f32.xlu1 %v602_v53 }
 0x283   :  { %600 = vmax.xlane.f32.xlu0 %v599_v54 }
 0x290   :  { %637 = vrot.lane.b32.xlu1 %v1375_v23, %s1242_s2 }
 0x308   :  { %v598_v55 = vpop.xlane.xlu0 %597 }
 0x309   :  { %v606_v56 = vsub.f32 %v431_v43, %v598_v55 }
 0x30b   :  { %v611_v60 = vmul.f32 1.442695, %v606_v56 }
 0x30c   :  { %v595_v57 = vpop.xlane.xlu0 %594  ;;  %v604_v58 = vpop.xlane.xlu1 %603 }
 0x30d   :  { %v605_v59 = vsub.f32 %v353_v46, %v595_v57  ;;  %v608_v62 = vsub.f32 %v589_v49, %v604_v58 }
 0x30f   :  { %v609_v61 = vmul.f32 1.442695, %v605_v59  ;;  %v615_v2 = vmul.f32 1.442695, %v608_v62 }
 0x310   :  { %v601_v63 = vpop.xlane.xlu0 %600  ;;  %v638_v0 = vpop.permute.xlu1 %637 }
 0x311   :  { %1099 = vpow2.f32 %v609_v61  ;;  %v607_v1 = vsub.f32 %v511_v51, %v601_v63  ;;  %1052 = vmatpush3.msra.mxu1 %v638_v0 }
 0x312   :  { %1056 = vmatprep.subr.mxu1 %v1239_v15  ;;  %1101 = vpow2.f32 %v611_v60 }
 0x313   :  { %v613_v3 = vmul.f32 1.442695, %v607_v1 }
 0x315   :  { %1103 = vpow2.f32 %v613_v3 }
 0x316   :  { %1105 = vpow2.f32 %v615_v2 }
 0x31b   :  { %v1100_v4 = vpop.eup %1099 }
 0x31c   :  { %v617_v5 = vsel %vm592_vm4, %v1100_v4, 0.0  ;;  %v1102_v6 = vpop.eup %1101 }
 0x31d   :  { %618 = vadd.xlane.f32.xlu1 %v617_v5  ;;  %v620_v9 = vsel %vm592_vm4, %v1102_v6, 0.0 }
 0x31f   :  { %v1104_v7 = vpop.eup %1103 }
 0x320   :  { %v623_v8 = vsel %vm592_vm4, %v1104_v7, 0.0  ;;  %v1106_v10 = vpop.eup %1105 }
 0x321   :  { %624 = vadd.xlane.f32.xlu0 %v623_v8  ;;  %621 = vadd.xlane.f32.xlu1 %v620_v9  ;;  %v626_v11 = vsel %vm592_vm4, %v1106_v10, 0.0 }
 0x325   :  { %627 = vadd.xlane.f32.xlu0 %v626_v11 }
 0x332   :  { %713 = vrot.lane.b32.xlu1 %v1375_v23, %s1243_s8 }
 0x336   :  { %867 = vrot.lane.b32.xlu1 %v1373_v21, %s1243_s8 }
 0x33b   :  { %791 = vrot.lane.b32.xlu0 %v1373_v21, %s1242_s2 }
 0x3aa   :  { %v619_v12 = vpop.xlane.xlu1 %618 }
 0x3ae   :  { %v625_v13 = vpop.xlane.xlu0 %624  ;;  %v622_v14 = vpop.xlane.xlu1 %621 }
 0x3af   :  { %1107 = vrcp.f32 %v622_v14 }
 0x3b2   :  { %v628_v16 = vpop.xlane.xlu0 %627  ;;  %v714_v19 = vpop.permute.xlu1 %713 }
 0x3b3   :  { %1109 = vrcp.f32 %v628_v16 }
 0x3b4   :  { %1111 = vrcp.f32 %v619_v12 }
 0x3b5   :  { %1113 = vrcp.f32 %v625_v13 }
 0x3b6   :  { %v792_v17 = vpop.permute.xlu0 %791  ;;  %v868_v24 = vpop.permute.xlu1 %867 }
 0x3b7   :  { %1062 = vmatpush3.msra.mxu0 %v792_v17 }
 0x3b8   :  { %1066 = vmatprep.subr.mxu0 %v1239_v15 }
 0x3b9   :  { %v1108_v18 = vpop.eup %1107 }
 0x3ba   :  { %v632_v20 = vmul.f32 %v1108_v18, %v1102_v6 }
 0x3bc   :  { %1054 = vmatmul.mubr.msk.f32.vlgmr.msra.gmra.mrb[4].mxu1 %vm592_vm4, %v632_v20 }
 0x3bd   :  { %v1110_v22 = vpop.eup %1109  ;;  %1057 = vmatpush3.msra.mxu1 %v714_v19  ;;  %1058 = vmatprep.mubr.msk.f32.mxu1 %vm1240_vm2, %v1239_v15 }
 0x3be   :  { %v636_v23 = vmul.f32 %v1110_v22, %v1106_v10  ;;  %v1112_v21 = vpop.eup %1111 }
 0x3bf   :  { %v1114_v25 = vpop.eup %1113  ;;  %v630_v26 = vmul.f32 %v1112_v21, %v1100_v4 }
 0x3c0   :  { %1064 = vmatmul.mubr.msk.f32.vlgmr.msra.gmra.mrb[8].mxu0 %vm592_vm4, %v636_v23  ;;  %v634_v27 = vmul.f32 %v1114_v25, %v1104_v7 }
 0x3c1   :  { %1067 = vmatpush3.msra.mxu0 %v868_v24  ;;  %1068 = vmatprep.mubr.msk.f32.mxu0 %vm1240_vm2, %v1239_v15 }
 0x3c4   :  { %1059 = vmatmul.mubr.msk.f32.vlgmr.msra.gmra.mrb[4].mxu1 %vm592_vm4, %v630_v26 }
 0x3c8   :  { %1069 = vmatmul.mubr.msk.f32.vlgmr.msra.gmra.mrb[8].mxu0 %vm592_vm4, %v634_v27 }
 0x497   :  { %v785_v28 = vpop.f32.mrb[4].mxu1 }
 0x498   :  { %790 = vst.msk [vmem:[#allocation10] sm:$0xff] %vm789_vm5, %v785_v28  ;;  %v1060_v29 = vpop.f32.mrb[5].mxu1 }
 0x49b   :  { %v939_v30 = vpop.f32.mrb[8].mxu0 }
 0x49c   :  { %943 = vst.msk [vmem:[#allocation10 + $0x8] sm:$0xff] %vm789_vm5, %v939_v30  ;;  %v1070_v31 = vpop.f32.mrb[9].mxu0 }
 0x49d   :  { %1214 = shalt.err (!%p1211_p8)
}
 0x49e   :  { %s1215_s16 = scalar_lea.hbm %s1450_s7, 256 }
 0x49f   :  { %p1216_p9 = scmp.ne.s32.totalorder %s1450_s7, %s1215_s16  ;;  %p1219_p10 = scmp.lt.u32.totalorder %s1215_s16, %s1450_s7 }
 0x4a1   :  { %p1221_p11 = pnand %p1219_p10, %p1216_p9 }
 0x4a3   :  { %1224 = shalt.err (!%p1221_p11)
}
 0x4a4   :  { %955 = dma.vmem_to_hbm [thread:$0]  %s950_s10, 256, %s1450_s7, [#allocation4], %s1235_s13, %s1235_s13, %s1236_s14  }
 0x4a5   :  { %1231 = dma.done.wait [#allocation4], 256  }
 0x4a6   :  { %1232 = vsyncadd [#allocation4], 4294967040 }
 0x4a7   :  { %959 = vsyncpa [#allocation3], 1 }
 0x4a8   :  { %960 = vsyncpa [#allocation6], 1 }
 0x4a9   :  { %961 = vsyncpa [#allocation9], 1 }
 0x4aa   :  { %962 = vsyncpa [#allocation4], 1 }

</bundles_post_ra>
